<compile_context>
chip_gen: v6e
topology: v6e:2x2x1
jax: 0.10.0
libtpu: 0.0.40
codegen_flags: <defaults>
</compile_context>

<pallas_src>
import functools
import math

import jax
import jax.numpy as jnp
import numpy as np
from jax import lax
from jax.experimental import pallas as pl
from jax.experimental.pallas import tpu as pltpu


def _round_up(x: int, m: int) -> int:
    return ((x + m - 1) // m) * m


def _cdiv(a: int, b: int) -> int:
    return (a + b - 1) // b


def _brl_kernel(preds_ref, gts_ref, mask_ref, out_ref, sum_ref, cnt_ref,
                *, t_total, t_tile, chunk_cols, t_ragged):
    # preds_ref / gts_ref: (blk_n, blk_t) native dtype; mask_ref: bool.
    # out_ref: (blk_n, 1) f32 per-sample mean.
    # sum_ref / cnt_ref: (blk_n, 128) f32 lane-wide running accumulators.
    j = pl.program_id(1)

    @pl.when(j == 0)
    def _init():
        sum_ref[...] = jnp.zeros_like(sum_ref)
        cnt_ref[...] = jnp.zeros_like(cnt_ref)

    n_chunks = t_tile // chunk_cols
    n_fold = chunk_cols // 128

    # Process the block in column chunks read straight from the refs so the
    # f32 intermediates stay small regardless of t_tile (VMEM friendly).
    for c in range(n_chunks):
        lo = c * chunk_cols
        x = preds_ref[:, lo:lo + chunk_cols].astype(jnp.float32)
        y = gts_ref[:, lo:lo + chunk_cols].astype(jnp.float32)
        m = mask_ref[:, lo:lo + chunk_cols]
        if m.dtype != jnp.bool_:
            m = m != 0

        if t_ragged:
            # Kill the columns past the true T (their contents are undefined
            # because the edge block is not padded on the host side).
            col = lax.broadcasted_iota(jnp.int32, x.shape, 1) + (j * t_tile + lo)
            m = jnp.logical_and(m, col < t_total)

        # Numerically stable BCE with logits (matches torch.nn.BCEWithLogitsLoss):
        #   l = max(x, 0) - x*y + log(1 + exp(-|x|))
        bce = jnp.maximum(x, 0.0) - x * y + jnp.log(1.0 + jnp.exp(-jnp.abs(x)))
        # Select (not multiply) so garbage/NaN in out-of-bounds or unmasked
        # positions can never leak into the accumulation.
        bce = jnp.where(m, bce, 0.0)
        mf = m.astype(jnp.float32)

        # Lane-wide partial sums: pure VPU adds; the cross-lane XLU reduce is
        # deferred to the finalize step.
        s = bce[:, 0:128]
        k = mf[:, 0:128]
        for f in range(1, n_fold):
            s = s + bce[:, f * 128:(f + 1) * 128]
            k = k + mf[:, f * 128:(f + 1) * 128]
        sum_ref[...] += s
        cnt_ref[...] += k

    @pl.when(j == pl.num_programs(1) - 1)
    def _finalize():
        tot = jnp.sum(sum_ref[...], axis=-1, keepdims=True)
        cnt = jnp.sum(cnt_ref[...], axis=-1, keepdims=True)
        # Guarded division: rows with zero valid elements (all-False mask or
        # the ragged N-tail rows of the last block) produce 0.0 instead of NaN.
        out_ref[...] = jnp.where(cnt > 0.0, tot, 0.0) / jnp.maximum(cnt, 1.0)


def boundary_regression_loss(preds, gts, masks, *, n_tile=256, t_tile=4096,
                             vmem_limit_bytes=None):
    """preds: (N, 1, T) float (f32/bf16); gts: (N, 1, T); masks: (N, 1, T) bool."""
    N, C, T = preds.shape
    assert C == 1

    # Pure metadata reshapes: no astype, no pad -> no extra HBM passes.
    p = preds.reshape(N, T)
    g = gts.reshape(N, T)
    m = masks.reshape(N, T)

    # N tile: multiple of 32 (safe sublane packing for bool/bf16/f32) and
    # capped at ceil(N/2) so grid[0] >= 2 whenever the batch allows it
    # (keeps both v7x TensorCores busy via the "parallel" axis).
    blk_n = max(32, min(_round_up(n_tile, 32), _round_up(_cdiv(N, 2), 32)))
    # T tile: lane dense (multiple of 128), capped at the rounded-up seq len.
    blk_t = min(_round_up(t_tile, 128), _round_up(T, 128))

    grid = (_cdiv(N, blk_n), _cdiv(T, blk_t))
    t_ragged = (T % blk_t) != 0
    chunk_cols = math.gcd(blk_t, 1024)  # <=1024-lane compute chunks, divides blk_t

    if vmem_limit_bytes is None:
        try:
            cap = getattr(pltpu.get_tpu_info(), "vmem_capacity_bytes", 64 * 2**20)
        except Exception:
            cap = 64 * 2**20
        # 128-MiB-VMEM chips (v5e/v6e): 64 MiB scoped; 64-MiB chips (v7x): 48 MiB.
        vmem_limit_bytes = (64 if cap >= 128 * 2**20 else 48) * 2**20

    kernel = functools.partial(_brl_kernel, t_total=T, t_tile=blk_t,
                               chunk_cols=chunk_cols, t_ragged=t_ragged)

    per_sample_mean = pl.pallas_call(
        kernel,
        out_shape=jax.ShapeDtypeStruct((N, 1), jnp.float32),
        grid_spec=pltpu.PrefetchScalarGridSpec(
            num_scalar_prefetch=0,
            grid=grid,
            in_specs=[
                pl.BlockSpec((blk_n, blk_t), lambda i, j: (i, j)),
                pl.BlockSpec((blk_n, blk_t), lambda i, j: (i, j)),
                pl.BlockSpec((blk_n, blk_t), lambda i, j: (i, j)),
            ],
            out_specs=pl.BlockSpec((blk_n, 1), lambda i, j: (i, 0)),
            scratch_shapes=[
                pltpu.VMEM((blk_n, 128), jnp.float32),  # running per-sample sums
                pltpu.VMEM((blk_n, 128), jnp.float32),  # running per-sample counts
            ],
        ),
        compiler_params=pltpu.CompilerParams(
            dimension_semantics=("parallel", "arbitrary"),
            vmem_limit_bytes=vmem_limit_bytes,
        ),
    )(p, g, m)

    # Tiny cross-sample reduction + 1/N scale in plain JAX.
    return jnp.sum(per_sample_mean[:, 0]) * (1.0 / float(N))


def _reference(preds, gts, masks):
    # Vectorized plain-JAX reference mirroring the PyTorch per-sample loop.
    x = preds[:, 0].astype(jnp.float32)
    y = gts[:, 0].astype(jnp.float32)
    mk = masks[:, 0]
    bce = jnp.maximum(x, 0.0) - x * y + jnp.log(1.0 + jnp.exp(-jnp.abs(x)))
    per = jnp.sum(jnp.where(mk, bce, 0.0), axis=-1) / jnp.sum(mk.astype(jnp.float32), axis=-1)
    return jnp.sum(per) / preds.shape[0]


if __name__ == "__main__":
    key = jax.random.PRNGKey(0)
    k1, k2, k3, k4, k5, k6 = jax.random.split(key, 6)

    # --- Test 1: tiny shape matching the module docstring (N, 1, T) ---------
    N, T = 2, 8
    preds = jax.random.normal(k1, (N, 1, T), dtype=jnp.float32)
    gts = (jax.random.uniform(k2, (N, 1, T)) > 0.5).astype(jnp.float32)
    masks = jax.random.uniform(k3, (N, 1, T)) > 0.3
    masks = masks.at[:, :, 0].set(True)  # ensure >=1 valid element per sample

    loss = jax.block_until_ready(boundary_regression_loss(preds, gts, masks))
    ref = jax.block_until_ready(_reference(preds, gts, masks))
    assert np.allclose(np.asarray(loss), np.asarray(ref), rtol=1e-5, atol=1e-5), (
        f"pallas={loss} ref={ref}"
    )

    # --- Test 2: exercise multi-block grid, ragged N and T tails ------------
    N2, T2 = 40, 300
    preds2 = jax.random.normal(k4, (N2, 1, T2), dtype=jnp.float32)
    gts2 = (jax.random.uniform(k5, (N2, 1, T2)) > 0.5).astype(jnp.float32)
    masks2 = jax.random.uniform(k6, (N2, 1, T2)) > 0.3
    masks2 = masks2.at[:, :, 0].set(True)

    loss2 = jax.block_until_ready(
        boundary_regression_loss(preds2, gts2, masks2, n_tile=32, t_tile=128)
    )
    ref2 = jax.block_until_ready(_reference(preds2, gts2, masks2))
    assert np.allclose(np.asarray(loss2), np.asarray(ref2), rtol=1e-5, atol=1e-5), (
        f"pallas={loss2} ref={ref2}"
    )

    # --- Test 3: native bf16 streams + default tiling path ------------------
    preds3 = preds2.astype(jnp.bfloat16)
    gts3 = gts2.astype(jnp.bfloat16)
    loss3 = jax.block_until_ready(boundary_regression_loss(preds3, gts3, masks2))
    ref3 = jax.block_until_ready(_reference(preds3, gts3, masks2))
    assert np.allclose(np.asarray(loss3), np.asarray(ref3), rtol=1e-4, atol=1e-4), (
        f"pallas={loss3} ref={ref3}"
    )

    print("KERNEL_OK")
</pallas_src>

<mosaic_0001>
module attributes {stable_mosaic.version = 11 : i64} {
  func.func @_brl_kernel(%arg0: i32, %arg1: i32, %arg2: memref<32x128xf32, #tpu.memory_space<vmem>>, %arg3: memref<32x128xf32, #tpu.memory_space<vmem>>, %arg4: memref<32x128xi32, #tpu.memory_space<vmem>>, %arg5: memref<32x1xf32, #tpu.memory_space<vmem>>, %arg6: memref<32x128xf32, #tpu.memory_space<vmem>>, %arg7: memref<32x128xf32, #tpu.memory_space<vmem>>) attributes {dimension_semantics = [#tpu.dimension_semantics<parallel>, #tpu.dimension_semantics<arbitrary>], iteration_bounds = array<i64: 1, 1>, scalar_prefetch = 0 : i64, scratch_operands = 2 : i64, tpu.core_type = #tpu.core_type<tc>, window_params = [{transform_indices = @transform_0, window_bounds = array<i64: 32, 128>}, {transform_indices = @transform_1, window_bounds = array<i64: 32, 128>}, {transform_indices = @transform_2, window_bounds = array<i64: 32, 128>}, {transform_indices = @transform_3, window_bounds = array<i64: 32, 1>}]} {
    %c0_i32 = arith.constant 0 : i32
    %0 = arith.cmpi eq, %arg1, %c0_i32 : i32
    %1 = arith.extui %0 : i1 to i32
    %c0_i32_0 = arith.constant 0 : i32
    %2 = arith.cmpi ne, %1, %c0_i32_0 : i32
    scf.if %2 {
      %cst_21 = arith.constant 0.000000e+00 : f32
      %40 = vector.broadcast %cst_21 : f32 to vector<32x128xf32>
      %c0_22 = arith.constant 0 : index
      %c0_23 = arith.constant 0 : index
      %41 = vector.load %arg6[%c0_22, %c0_23] : memref<32x128xf32, #tpu.memory_space<vmem>>, vector<32x128xf32>
      tpu.vector_store %arg6[%c0_22, %c0_23], %40 {strides = array<i32>} : memref<32x128xf32, #tpu.memory_space<vmem>>, vector<32x128xf32>,
      %cst_24 = arith.constant 0.000000e+00 : f32
      %42 = vector.broadcast %cst_24 : f32 to vector<32x128xf32>
      %c0_25 = arith.constant 0 : index
      %c0_26 = arith.constant 0 : index
      %43 = vector.load %arg7[%c0_25, %c0_26] : memref<32x128xf32, #tpu.memory_space<vmem>>, vector<32x128xf32>
      tpu.vector_store %arg7[%c0_25, %c0_26], %42 {strides = array<i32>} : memref<32x128xf32, #tpu.memory_space<vmem>>, vector<32x128xf32>,
    } else {
    }
    %c0 = arith.constant 0 : index
    %c0_1 = arith.constant 0 : index
    %3 = vector.load %arg2[%c0, %c0_1] : memref<32x128xf32, #tpu.memory_space<vmem>>, vector<32x128xf32>
    %c0_2 = arith.constant 0 : index
    %c0_3 = arith.constant 0 : index
    %4 = vector.load %arg3[%c0_2, %c0_3] : memref<32x128xf32, #tpu.memory_space<vmem>>, vector<32x128xf32>
    %c0_4 = arith.constant 0 : index
    %c0_5 = arith.constant 0 : index
    %5 = vector.load %arg4[%c0_4, %c0_5] : memref<32x128xi32, #tpu.memory_space<vmem>>, vector<32x128xi32>
    %cst = arith.constant dense<0> : vector<32x128xi32>
    %6 = arith.cmpi ne, %5, %cst : vector<32x128xi32>
    %7 = tpu.iota {dimensions = array<i32: 1>} : vector<32x128xi32>
    %c128_i32 = arith.constant 128 : i32
    %8 = arith.muli %arg1, %c128_i32 : i32
    %c0_i32_6 = arith.constant 0 : i32
    %9 = arith.addi %8, %c0_i32_6 : i32
    %10 = vector.broadcast %9 : i32 to vector<32x128xi32>
    %11 = arith.addi %7, %10 : vector<32x128xi32>
    %c8_i32 = arith.constant 8 : i32
    %12 = vector.broadcast %c8_i32 : i32 to vector<32x128xi32>
    %13 = arith.cmpi slt, %11, %12 : vector<32x128xi32>
    %14 = arith.andi %6, %13 : vector<32x128xi1>
    %cst_7 = arith.constant 0.000000e+00 : f32
    %15 = vector.broadcast %cst_7 : f32 to vector<32x128xf32>
    %16 = arith.maximumf %3, %15 : vector<32x128xf32>
    %17 = arith.mulf %3, %4 : vector<32x128xf32>
    %18 = arith.subf %16, %17 : vector<32x128xf32>
    %19 = math.absf %3 : vector<32x128xf32>
    %cst_8 = arith.constant 0.000000e+00 : f32
    %20 = vector.broadcast %cst_8 : f32 to vector<32x128xf32>
    %21 = arith.subf %20, %19 : vector<32x128xf32>
    %22 = math.exp %21 : vector<32x128xf32>
    %cst_9 = arith.constant 1.000000e+00 : f32
    %23 = vector.broadcast %cst_9 : f32 to vector<32x128xf32>
    %24 = arith.addf %23, %22 : vector<32x128xf32>
    %25 = math.log %24 : vector<32x128xf32>
    %26 = arith.addf %18, %25 : vector<32x128xf32>
    %cst_10 = arith.constant 0.000000e+00 : f32
    %27 = vector.broadcast %cst_10 : f32 to vector<32x128xf32>
    %28 = arith.select %14, %26, %27 : vector<32x128xi1>, vector<32x128xf32>
    %29 = arith.extui %14 : vector<32x128xi1> to vector<32x128xi32>
    %30 = arith.sitofp %29 : vector<32x128xi32> to vector<32x128xf32>
    %c0_11 = arith.constant 0 : index
    %c0_12 = arith.constant 0 : index
    %31 = vector.load %arg6[%c0_11, %c0_12] : memref<32x128xf32, #tpu.memory_space<vmem>>, vector<32x128xf32>
    %32 = arith.addf %31, %28 : vector<32x128xf32>
    %c0_13 = arith.constant 0 : index
    %c0_14 = arith.constant 0 : index
    %33 = vector.load %arg6[%c0_13, %c0_14] : memref<32x128xf32, #tpu.memory_space<vmem>>, vector<32x128xf32>
    tpu.vector_store %arg6[%c0_13, %c0_14], %32 {strides = array<i32>} : memref<32x128xf32, #tpu.memory_space<vmem>>, vector<32x128xf32>,
    %c0_15 = arith.constant 0 : index
    %c0_16 = arith.constant 0 : index
    %34 = vector.load %arg7[%c0_15, %c0_16] : memref<32x128xf32, #tpu.memory_space<vmem>>, vector<32x128xf32>
    %35 = arith.addf %34, %30 : vector<32x128xf32>
    %c0_17 = arith.constant 0 : index
    %c0_18 = arith.constant 0 : index
    %36 = vector.load %arg7[%c0_17, %c0_18] : memref<32x128xf32, #tpu.memory_space<vmem>>, vector<32x128xf32>
    tpu.vector_store %arg7[%c0_17, %c0_18], %35 {strides = array<i32>} : memref<32x128xf32, #tpu.memory_space<vmem>>, vector<32x128xf32>,
    %c0_i32_19 = arith.constant 0 : i32
    %37 = arith.cmpi eq, %arg1, %c0_i32_19 : i32
    %38 = arith.extui %37 : i1 to i32
    %c0_i32_20 = arith.constant 0 : i32
    %39 = arith.cmpi ne, %38, %c0_i32_20 : i32
    scf.if %39 {
      %c0_21 = arith.constant 0 : index
      %c0_22 = arith.constant 0 : index
      %40 = vector.load %arg6[%c0_21, %c0_22] : memref<32x128xf32, #tpu.memory_space<vmem>>, vector<32x128xf32>
      %cst_23 = arith.constant dense<0.000000e+00> : vector<32xf32>
      %41 = vector.multi_reduction <add>, %40, %cst_23 [1] : vector<32x128xf32> to vector<32xf32>
      %42 = vector.shape_cast %41 : vector<32xf32> to vector<32x1xf32>
      %c0_24 = arith.constant 0 : index
      %c0_25 = arith.constant 0 : index
      %43 = vector.load %arg7[%c0_24, %c0_25] : memref<32x128xf32, #tpu.memory_space<vmem>>, vector<32x128xf32>
      %cst_26 = arith.constant dense<0.000000e+00> : vector<32xf32>
      %44 = vector.multi_reduction <add>, %43, %cst_26 [1] : vector<32x128xf32> to vector<32xf32>
      %45 = vector.shape_cast %44 : vector<32xf32> to vector<32x1xf32>
      %cst_27 = arith.constant 0.000000e+00 : f32
      %46 = vector.broadcast %cst_27 : f32 to vector<32x1xf32>
      %47 = arith.cmpf ogt, %45, %46 : vector<32x1xf32>
      %cst_28 = arith.constant 0.000000e+00 : f32
      %48 = vector.broadcast %cst_28 : f32 to vector<32x1xf32>
      %49 = arith.select %47, %42, %48 : vector<32x1xi1>, vector<32x1xf32>
      %cst_29 = arith.constant 1.000000e+00 : f32
      %50 = vector.broadcast %cst_29 : f32 to vector<32x1xf32>
      %51 = arith.maximumf %45, %50 : vector<32x1xf32>
      %52 = arith.divf %49, %51 : vector<32x1xf32>
      %c0_30 = arith.constant 0 : index
      %c0_31 = arith.constant 0 : index
      %53 = vector.load %arg5[%c0_30, %c0_31] : memref<32x1xf32, #tpu.memory_space<vmem>>, vector<32x1xf32>
      tpu.vector_store %arg5[%c0_30, %c0_31], %52 {strides = array<i32>} : memref<32x1xf32, #tpu.memory_space<vmem>>, vector<32x1xf32>,
    } else {
    }
    return
  }
  func.func @transform_0(%arg0: i32, %arg1: i32) -> (i32, i32) {
    %c0_i32 = arith.constant 0 : i32
    return %arg0, %arg1 : i32, i32
  }
  func.func @transform_1(%arg0: i32, %arg1: i32) -> (i32, i32) {
    %c0_i32 = arith.constant 0 : i32
    return %arg0, %arg1 : i32, i32
  }
  func.func @transform_2(%arg0: i32, %arg1: i32) -> (i32, i32) {
    %c0_i32 = arith.constant 0 : i32
    return %arg0, %arg1 : i32, i32
  }
  func.func @transform_3(%arg0: i32, %arg1: i32) -> (i32, i32) {
    %c0_i32 = arith.constant 0 : i32
    %c0_i32_0 = arith.constant 0 : i32
    return %arg0, %c0_i32 : i32, i32
  }
}

</mosaic_0001>

<bundles_post_ra>
// kernel: tpu_custom_call.1
= control target key start
LH: loop header
LB: loop body
LE: loop exit
PB: predicated region body
PF: predicated region fallthrough
CT: control target
= control target key end

     0   :  { %v42_v1 = vlaneseq  ;;  %v254_v16 = vmov 0.0   ;;  %vm179_vm9 = vcmask 7168   ;;  %s361_s0 = inlined_call_operand.vmem [shape: f32[2,8], index: 0, kind: input, shape index: {}]   ;;  %s362_s1 = inlined_call_operand.vmem [shape: f32[2,8], index: 1, kind: input, shape index: {}]   ;;  %s363_s2 = inlined_call_operand.vmem [shape: s32[2,8], index: 2, kind: input, shape index: {}]   ;;  %s364_s3 = inlined_call_operand.vmem [shape: f32[2,1], index: 3, kind: output, shape index: {}]  }
   0x1   :  { %v34_v0 = vld [vmem:[%s363_s2] sm:$0xff]  ;;  %v36_v2 = vld [vmem:[%s363_s2 + $0x10] sm:$0xff]  ;;  %v35_v3 = vld [vmem:[%s363_s2 + $0x8] sm:$0xff] }
   0x2   :  { %v287_v4 = vld [vmem:[%s361_s0 + $0x8] sm:$0xff]  ;;  %vm38_vm0 = vcmp.ne.s32.totalorder %v34_v0, 0  ;;  %v43_v5 = vand.u32 127, %v42_v1  ;;  %v37_v6 = vld [vmem:[%s363_s2 + $0x18] sm:$0xff]  ;;  %v26_v7 = vld [vmem:[%s361_s0] sm:$0xff]  ;;  %vm40_vm1 = vcmp.ne.s32.totalorder %v36_v2, 0 }
   0x3   :  { %v298_v8 = vld [vmem:[%s361_s0 + $0x18] sm:$0xff]  ;;  %v65_v9 = vand.u32 2147483647, %v287_v4  ;;  %v64_v10 = vand.u32 2147483647, %v26_v7  ;;  %vm39_vm3 = vcmp.ne.s32.totalorder %v35_v3, 0 }
   0x4   :  { %vm47_vm2 = vcmp.lt.s32.totalorder %v43_v5, 8  ;;  %vm41_vm5 = vcmp.ne.s32.totalorder %v37_v6, 0  ;;  %v67_v14 = vand.u32 2147483647, %v298_v8  ;;  %v28_v15 = vld [vmem:[%s361_s0 + $0x10] sm:$0xff]  ;;  %v31_v39 = vld [vmem:[%s362_s1 + $0x8] sm:$0xff] }
   0x5   :  { %vm302_vm4 = vmand %vm38_vm0, %vm47_vm2  ;;  %v69_v12 = vsub.f32 0.0, %v65_v9  ;;  %v68_v13 = vsub.f32 0.0, %v64_v10  ;;  %v66_v26 = vand.u32 2147483647, %v28_v15  ;;  %v30_v40 = vld [vmem:[%s362_s1] sm:$0xff]  ;;  %v33_v41 = vld [vmem:[%s362_s1 + $0x18] sm:$0xff]  ;;  %v57_v43 = vmul.f32 %v31_v39, %v287_v4 }
   0x6   :  { %v225_v17 = vsel %vm302_vm4, 1.0, %v254_v16  ;;  %vm313_vm6 = vmand %vm40_vm1, %vm47_vm2  ;;  %v71_v23 = vsub.f32 0.0, %v67_v14  ;;  %v53_v42 = vmax.f32 %v287_v4, 0.0  ;;  %v52_v44 = vmax.f32 %v26_v7, 0.0  ;;  %v32_v48 = vld [vmem:[%s362_s1 + $0x10] sm:$0xff] }
   0x7   :  { %151 = vadd.xlane.f32.xlu0 %v225_v17  ;;  %v227_v19 = vsel %vm313_vm6, 1.0, %v254_v16  ;;  %vm320_vm7 = vmand %vm39_vm3, %vm47_vm2  ;;  %v74_v21 = vmul.f32 1.442695, %v69_v12  ;;  %v72_v22 = vmul.f32 1.442695, %v68_v13  ;;  %v70_v29 = vsub.f32 0.0, %v66_v26 }
   0x8   :  { %155 = vadd.xlane.f32.xlu1 %v227_v19  ;;  %v226_v24 = vsel %vm320_vm7, 1.0, %v254_v16  ;;  %vm328_vm8 = vmand %vm41_vm5, %vm47_vm2  ;;  %v78_v28 = vmul.f32 1.442695, %v71_v23  ;;  %v56_v45 = vmul.f32 %v30_v40, %v26_v7  ;;  %v55_v46 = vmax.f32 %v298_v8, 0.0 }
   0x9   :  { %v228_v27 = vsel %vm328_vm8, 1.0, %v254_v16  ;;  %230 = vpow2.f32 %v74_v21  ;;  %v76_v30 = vmul.f32 1.442695, %v70_v29  ;;  %v59_v47 = vmul.f32 %v33_v41, %v298_v8 }
   0xa   :  { %232 = vpow2.f32 %v72_v22  ;;  %v61_v49 = vsub.f32 %v53_v42, %v57_v43  ;;  %v60_v51 = vsub.f32 %v52_v44, %v56_v45  ;;  %v54_v52 = vmax.f32 %v28_v15, 0.0 }
   0xb   :  { %153 = vadd.xlane.f32.xlu0 %v226_v24  ;;  %234 = vpow2.f32 %v78_v28  ;;  %v58_v53 = vmul.f32 %v32_v48, %v28_v15  ;;  %v63_v56 = vsub.f32 %v55_v46, %v59_v47 }
   0xc   :  { %157 = vadd.xlane.f32.xlu1 %v228_v27  ;;  %236 = vpow2.f32 %v76_v30 }
   0xd   :  { %v62_v62 = vsub.f32 %v54_v52, %v58_v53 }
  0x16   :  { %v231_v31 = vpop.eup %230 }
  0x17   :  { %v233_v32 = vpop.eup %232  ;;  %v81_v33 = vadd.f32 1.0, %v231_v31 }
  0x18   :  { %v235_v34 = vpop.eup %234  ;;  %v80_v35 = vadd.f32 1.0, %v233_v32 }
  0x19   :  { %238 = vlog2.f32 %v81_v33  ;;  %v83_v36 = vadd.f32 1.0, %v235_v34  ;;  %v237_v37 = vpop.eup %236 }
  0x1a   :  { %240 = vlog2.f32 %v80_v35  ;;  %v82_v38 = vadd.f32 1.0, %v237_v37 }
  0x1b   :  { %242 = vlog2.f32 %v83_v36 }
  0x1c   :  { %244 = vlog2.f32 %v82_v38 }
  0x26   :  { %v239_v50 = vpop.eup %238 }
  0x27   :  { %v241_v54 = vpop.eup %240  ;;  %v87_v55 = vmul.f32 0.6931472, %v239_v50 }
  0x28   :  { %v243_v57 = vpop.eup %242  ;;  %v85_v58 = vmul.f32 0.6931472, %v241_v54 }
  0x29   :  { %v93_v59 = vadd.f32 %v87_v55, %v61_v49  ;;  %v91_v60 = vmul.f32 0.6931472, %v243_v57  ;;  %v245_v63 = vpop.eup %244 }
  0x2a   :  { %v92_v61 = vadd.f32 %v85_v58, %v60_v51  ;;  %v89_v3 = vmul.f32 0.6931472, %v245_v63 }
  0x2b   :  { %v97_v0 = vsel %vm320_vm7, %v93_v59, 0.0  ;;  %v95_v1 = vadd.f32 %v91_v60, %v63_v56 }
  0x2c   :  { %141 = vadd.xlane.f32.xlu1 %v97_v0  ;;  %v96_v2 = vsel %vm302_vm4, %v92_v61, 0.0  ;;  %v94_v5 = vadd.f32 %v89_v3, %v62_v62 }
  0x2d   :  { %139 = vadd.xlane.f32.xlu0 %v96_v2  ;;  %v99_v4 = vsel %vm328_vm8, %v95_v1, 0.0 }
  0x2e   :  { %v98_v6 = vsel %vm313_vm6, %v94_v5, 0.0 }
  0x30   :  { %145 = vadd.xlane.f32.xlu1 %v99_v4 }
  0x31   :  { %143 = vadd.xlane.f32.xlu0 %v98_v6 }
  0x90   :  { %v152_v7 = vpop.xlane.xlu0 %151 }
  0x91   :  { %v156_v8 = vpop.xlane.xlu1 %155  ;;  %v167_v12 = vmax.f32 %v152_v7, 1.0  ;;  %vm159_vm10 = vcmp.gt.f32.partialorder %v152_v7, 0.0 }
  0x92   :  { %v169_v14 = vmax.f32 %v156_v8, 1.0 }
  0x94   :  { %v154_v9 = vpop.xlane.xlu0 %153 }
  0x95   :  { %v168_v10 = vmax.f32 %v154_v9, 1.0  ;;  %v158_v13 = vpop.xlane.xlu1 %157 }
  0x96   :  { %v170_v11 = vmax.f32 %v158_v13, 1.0 }
  0x97   :  { %246 = vrcp.f32 %v168_v10 }
  0x98   :  { %248 = vrcp.f32 %v167_v12 }
  0x99   :  { %250 = vrcp.f32 %v170_v11 }
  0x9a   :  { %252 = vrcp.f32 %v169_v14 }
  0xa4   :  { %v247_v15 = vpop.eup %246 }
  0xa5   :  { %v249_v16 = vpop.eup %248 }
  0xa6   :  { %v251_v20 = vpop.eup %250 }
  0xa7   :  { %v253_v22 = vpop.eup %252 }
  0xb5   :  { %v142_v17 = vpop.xlane.xlu1 %141 }
  0xb6   :  { %v140_v18 = vpop.xlane.xlu0 %139 }
  0xb7   :  { %v163_v19 = vsel %vm159_vm10, %v140_v18, 0.0 }
  0xb8   :  { %v172_v21 = vmul.f32 %v249_v16, %v163_v19 }
  0xb9   :  { %v146_v23 = vpop.xlane.xlu1 %145 }
  0xba   :  { %180 = vst.msk [vmem:[#allocation4] sm:$0xff] %vm179_vm9, %v172_v21  ;;  %v144_v24 = vpop.xlane.xlu0 %143 }
  0xc1   :  { %v202_v25 = vld [vmem:[#allocation4] sm:$0x3] }
  0xc2   :  { %203 = vst [vmem:[%s364_s3] sm:$0x3] %v202_v25 }

</bundles_post_ra>
